<compile_context>
chip_gen: v6e
topology: v6e:2x2x1
jax: 0.10.0
libtpu: 0.0.40
codegen_flags: <defaults>
</compile_context>

<pallas_src>
import jax
import jax.numpy as jnp
from jax import lax
from jax.experimental import pallas as pl
from jax.experimental.pallas import tpu as pltpu

LEAKY_SLOPE = 0.01
BN_EPS = 1e-5
DROPOUT_P = 0.2
KEEP_SCALE = 1.0 / (1.0 - DROPOUT_P)
# keep element iff bits >= round(p * 2^32)  ->  P(keep) = 1 - p (exact u32 compare)
DROP_THRESHOLD = round(DROPOUT_P * (1 << 32))


def dense_wrapper_kernel(x_ref, w_ref, b_ref, gamma_ref, beta_ref, bits_ref, o_ref):
    # ---- Linear: bf16 operands on the MXU, f32 accumulation ----
    y = jnp.dot(x_ref[...], w_ref[...], preferred_element_type=jnp.float32)
    y = y + b_ref[...]                                      # (B, tn) f32

    # ---- LeakyReLU (negative_slope = 0.01) ----
    y = jnp.where(y >= 0.0, y, LEAKY_SLOPE * y)

    # ---- BatchNorm1d (training: batch mean, biased variance over full B) ----
    mean = jnp.mean(y, axis=0, keepdims=True)               # (1, tn)
    var = jnp.mean(jnp.square(y - mean), axis=0, keepdims=True)
    g = gamma_ref[...] * lax.rsqrt(var + BN_EPS)            # (1, tn)
    # Fold BN affine and the dropout 1/(1-p) factor into one scale/shift.
    scale = g * KEEP_SCALE
    shift = (beta_ref[...] - mean * g) * KEEP_SCALE

    # ---- Dropout p=0.2 via raw uint32 threshold compare ----
    keep = bits_ref[...] >= jnp.uint32(DROP_THRESHOLD)
    o_ref[...] = jnp.where(keep, y * scale + shift, 0.0).astype(o_ref.dtype)


def dense_wrapper_forward(x, w, b, gamma, beta, dropout_key, *, tn=128):
    """DenseWrapper forward (training semantics).

    x: (B, Fin) f32; w: (Fin, Fout) f32 (stored transposed vs. torch.nn.Linear);
    b / gamma / beta: (Fout,) f32; dropout_key: jax PRNG key.
    """
    B, Fin = x.shape
    Fout = w.shape[1]
    fout_pad = pl.cdiv(Fout, tn) * tn
    pad = fout_pad - Fout

    # bf16 MXU operands; pad the feature dim to a lane-dense multiple of 128.
    xb = x.astype(jnp.bfloat16)
    wp = jnp.pad(w, ((0, 0), (0, pad))).astype(jnp.bfloat16)
    b2 = jnp.pad(b, (0, pad)).reshape(1, fout_pad).astype(jnp.float32)
    g2 = jnp.pad(gamma, (0, pad)).reshape(1, fout_pad).astype(jnp.float32)
    be2 = jnp.pad(beta, (0, pad)).reshape(1, fout_pad).astype(jnp.float32)

    # Dropout randomness generated outside the kernel (portable; no pltpu PRNG).
    bits = jax.random.bits(dropout_key, (B, fout_pad), dtype=jnp.uint32)

    out = pl.pallas_call(
        dense_wrapper_kernel,
        out_shape=jax.ShapeDtypeStruct((B, fout_pad), jnp.float32),
        grid=(fout_pad // tn,),
        in_specs=[
            pl.BlockSpec((B, Fin), lambda j: (0, 0)),   # x: resident across tiles
            pl.BlockSpec((Fin, tn), lambda j: (0, j)),  # weight tile
            pl.BlockSpec((1, tn), lambda j: (0, j)),    # bias
            pl.BlockSpec((1, tn), lambda j: (0, j)),    # bn gamma
            pl.BlockSpec((1, tn), lambda j: (0, j)),    # bn beta
            pl.BlockSpec((B, tn), lambda j: (0, j)),    # dropout random bits
        ],
        out_specs=pl.BlockSpec((B, tn), lambda j: (0, j)),
        compiler_params=pltpu.CompilerParams(
            dimension_semantics=("parallel",)),
    )(xb, wp, b2, g2, be2, bits)

    return out[:, :Fout]


if __name__ == "__main__":
    key = jax.random.PRNGKey(0)
    B, IN_FEATURES, OUT_FEATURES = 8, 32, 64

    kx, kw, kb, kd = jax.random.split(key, 4)
    x = jax.random.normal(kx, (B, IN_FEATURES), dtype=jnp.float32)

    # Deterministic param init (PyTorch-like uniform bound 1/sqrt(in_features))
    bound = 1.0 / (IN_FEATURES ** 0.5)
    w = jax.random.uniform(kw, (IN_FEATURES, OUT_FEATURES), jnp.float32, -bound, bound)
    b = jax.random.uniform(kb, (OUT_FEATURES,), jnp.float32, -bound, bound)
    gamma = jnp.ones((OUT_FEATURES,), jnp.float32)   # BatchNorm1d default weight
    beta = jnp.zeros((OUT_FEATURES,), jnp.float32)   # BatchNorm1d default bias

    out = dense_wrapper_forward(x, w, b, gamma, beta, kd)
    jax.block_until_ready(out)
    assert out.shape == (B, OUT_FEATURES) and out.dtype == jnp.float32
    assert bool(jnp.all(jnp.isfinite(out)))
    print("KERNEL_OK")
</pallas_src>

<mosaic_0001>
module attributes {stable_mosaic.version = 11 : i64} {
  func.func @dense_wrapper_kernel(%arg0: i32, %arg1: memref<8x32xbf16, #tpu.memory_space<vmem>>, %arg2: memref<32x128xbf16, #tpu.memory_space<vmem>>, %arg3: memref<1x128xf32, #tpu.memory_space<vmem>>, %arg4: memref<1x128xf32, #tpu.memory_space<vmem>>, %arg5: memref<1x128xf32, #tpu.memory_space<vmem>>, %arg6: memref<8x128xi32, #tpu.memory_space<vmem>>, %arg7: memref<8x128xf32, #tpu.memory_space<vmem>>) attributes {dimension_semantics = [#tpu.dimension_semantics<parallel>], iteration_bounds = array<i64: 1>, scalar_prefetch = 0 : i64, scratch_operands = 0 : i64, tpu.core_type = #tpu.core_type<tc>, window_params = [{pipeline_mode = #tpu.pipeline_mode<synchronous>, transform_indices = @transform_0, window_bounds = array<i64: 8, 32>}, {transform_indices = @transform_1, window_bounds = array<i64: 32, 128>}, {transform_indices = @transform_2, window_bounds = array<i64: 1, 128>}, {transform_indices = @transform_3, window_bounds = array<i64: 1, 128>}, {transform_indices = @transform_4, window_bounds = array<i64: 1, 128>}, {transform_indices = @transform_5, window_bounds = array<i64: 8, 128>}, {transform_indices = @transform_6, window_bounds = array<i64: 8, 128>}]} {
    %c0 = arith.constant 0 : index
    %c0_0 = arith.constant 0 : index
    %0 = vector.load %arg1[%c0, %c0_0] : memref<8x32xbf16, #tpu.memory_space<vmem>>, vector<8x32xbf16>
    %c0_1 = arith.constant 0 : index
    %c0_2 = arith.constant 0 : index
    %1 = vector.load %arg2[%c0_1, %c0_2] : memref<32x128xbf16, #tpu.memory_space<vmem>>, vector<32x128xbf16>
    %cst = arith.constant dense<0.000000e+00> : vector<8x128xf32>
    %2 = tpu.matmul %0, %1, %cst {dimension_numbers = #tpu.dot_dimension_numbers<[1], [0], [0], [1], [0, 0, 1, 1], [], []>} : vector<8x32xbf16>, vector<32x128xbf16>, vector<8x128xf32> -> vector<8x128xf32>
    %c0_3 = arith.constant 0 : index
    %c0_4 = arith.constant 0 : index
    %3 = vector.load %arg3[%c0_3, %c0_4] : memref<1x128xf32, #tpu.memory_space<vmem>>, vector<1x128xf32>
    %4 = vector.broadcast %3 : vector<1x128xf32> to vector<8x128xf32>
    %5 = arith.addf %2, %4 : vector<8x128xf32>
    %cst_5 = arith.constant 0.000000e+00 : f32
    %6 = vector.broadcast %cst_5 : f32 to vector<8x128xf32>
    %7 = arith.cmpf oge, %5, %6 : vector<8x128xf32>
    %cst_6 = arith.constant 0.00999999977 : f32
    %8 = vector.broadcast %cst_6 : f32 to vector<8x128xf32>
    %9 = arith.mulf %8, %5 : vector<8x128xf32>
    %10 = arith.select %7, %5, %9 : vector<8x128xi1>, vector<8x128xf32>
    %cst_7 = arith.constant dense<0.000000e+00> : vector<128xf32>
    %11 = vector.multi_reduction <add>, %10, %cst_7 [0] : vector<8x128xf32> to vector<128xf32>
    %12 = vector.shape_cast %11 : vector<128xf32> to vector<1x128xf32>
    %cst_8 = arith.constant 8.000000e+00 : f32
    %13 = vector.broadcast %cst_8 : f32 to vector<1x128xf32>
    %14 = arith.divf %12, %13 : vector<1x128xf32>
    %15 = vector.broadcast %14 : vector<1x128xf32> to vector<8x128xf32>
    %16 = arith.subf %10, %15 : vector<8x128xf32>
    %17 = arith.mulf %16, %16 : vector<8x128xf32>
    %cst_9 = arith.constant dense<0.000000e+00> : vector<128xf32>
    %18 = vector.multi_reduction <add>, %17, %cst_9 [0] : vector<8x128xf32> to vector<128xf32>
    %19 = vector.shape_cast %18 : vector<128xf32> to vector<1x128xf32>
    %cst_10 = arith.constant 8.000000e+00 : f32
    %20 = vector.broadcast %cst_10 : f32 to vector<1x128xf32>
    %21 = arith.divf %19, %20 : vector<1x128xf32>
    %c0_11 = arith.constant 0 : index
    %c0_12 = arith.constant 0 : index
    %22 = vector.load %arg4[%c0_11, %c0_12] : memref<1x128xf32, #tpu.memory_space<vmem>>, vector<1x128xf32>
    %cst_13 = arith.constant 9.99999974E-6 : f32
    %23 = vector.broadcast %cst_13 : f32 to vector<1x128xf32>
    %24 = arith.addf %21, %23 : vector<1x128xf32>
    %25 = math.rsqrt %24 : vector<1x128xf32>
    %26 = arith.mulf %22, %25 : vector<1x128xf32>
    %cst_14 = arith.constant 1.250000e+00 : f32
    %27 = vector.broadcast %cst_14 : f32 to vector<1x128xf32>
    %28 = arith.mulf %26, %27 : vector<1x128xf32>
    %c0_15 = arith.constant 0 : index
    %c0_16 = arith.constant 0 : index
    %29 = vector.load %arg5[%c0_15, %c0_16] : memref<1x128xf32, #tpu.memory_space<vmem>>, vector<1x128xf32>
    %30 = arith.mulf %14, %26 : vector<1x128xf32>
    %31 = arith.subf %29, %30 : vector<1x128xf32>
    %cst_17 = arith.constant 1.250000e+00 : f32
    %32 = vector.broadcast %cst_17 : f32 to vector<1x128xf32>
    %33 = arith.mulf %31, %32 : vector<1x128xf32>
    %c0_18 = arith.constant 0 : index
    %c0_19 = arith.constant 0 : index
    %34 = vector.load %arg6[%c0_18, %c0_19] : memref<8x128xi32, #tpu.memory_space<vmem>>, vector<8x128xi32>
    %c858993459_i32 = arith.constant 858993459 : i32
    %35 = vector.broadcast %c858993459_i32 : i32 to vector<8x128xi32>
    %36 = arith.cmpi uge, %34, %35 : vector<8x128xi32>
    %37 = vector.broadcast %28 : vector<1x128xf32> to vector<8x128xf32>
    %38 = arith.mulf %10, %37 : vector<8x128xf32>
    %39 = vector.broadcast %33 : vector<1x128xf32> to vector<8x128xf32>
    %40 = arith.addf %38, %39 : vector<8x128xf32>
    %cst_20 = arith.constant 0.000000e+00 : f32
    %41 = vector.broadcast %cst_20 : f32 to vector<8x128xf32>
    %42 = arith.select %36, %40, %41 : vector<8x128xi1>, vector<8x128xf32>
    %c0_21 = arith.constant 0 : index
    %c0_22 = arith.constant 0 : index
    %43 = vector.load %arg7[%c0_21, %c0_22] : memref<8x128xf32, #tpu.memory_space<vmem>>, vector<8x128xf32>
    tpu.vector_store %arg7[%c0_21, %c0_22], %42 {strides = array<i32>} : memref<8x128xf32, #tpu.memory_space<vmem>>, vector<8x128xf32>,
    return
  }
  func.func @transform_0(%arg0: i32) -> (i32, i32) {
    %c0_i32 = arith.constant 0 : i32
    %c0_i32_0 = arith.constant 0 : i32
    %c0_i32_1 = arith.constant 0 : i32
    return %c0_i32, %c0_i32_0 : i32, i32
  }
  func.func @transform_1(%arg0: i32) -> (i32, i32) {
    %c0_i32 = arith.constant 0 : i32
    %c0_i32_0 = arith.constant 0 : i32
    return %c0_i32, %arg0 : i32, i32
  }
  func.func @transform_2(%arg0: i32) -> (i32, i32) {
    %c0_i32 = arith.constant 0 : i32
    %c0_i32_0 = arith.constant 0 : i32
    return %c0_i32, %arg0 : i32, i32
  }
  func.func @transform_3(%arg0: i32) -> (i32, i32) {
    %c0_i32 = arith.constant 0 : i32
    %c0_i32_0 = arith.constant 0 : i32
    return %c0_i32, %arg0 : i32, i32
  }
  func.func @transform_4(%arg0: i32) -> (i32, i32) {
    %c0_i32 = arith.constant 0 : i32
    %c0_i32_0 = arith.constant 0 : i32
    return %c0_i32, %arg0 : i32, i32
  }
  func.func @transform_5(%arg0: i32) -> (i32, i32) {
    %c0_i32 = arith.constant 0 : i32
    %c0_i32_0 = arith.constant 0 : i32
    return %c0_i32, %arg0 : i32, i32
  }
  func.func @transform_6(%arg0: i32) -> (i32, i32) {
    %c0_i32 = arith.constant 0 : i32
    %c0_i32_0 = arith.constant 0 : i32
    return %c0_i32, %arg0 : i32, i32
  }
}

</mosaic_0001>

<bundles_post_ra>
// kernel: tpu_custom_call.1
= control target key start
LH: loop header
LB: loop body
LE: loop exit
PB: predicated region body
PF: predicated region fallthrough
CT: control target
= control target key end

     0   :  { %11 = vsyncpa [#allocation3], 0  ;;  %s407_s0 = inlined_call_operand.hbm [shape: bf16[8,32], index: 0, kind: input, shape index: {}]   ;;  %s408_s1 = inlined_call_operand.hbm [shape: bf16[32,128], index: 1, kind: input, shape index: {}]   ;;  %s409_s2 = inlined_call_operand.vmem [shape: f32[1,128], index: 2, kind: input, shape index: {}]   ;;  %s410_s3 = inlined_call_operand.hbm [shape: f32[1,128], index: 3, kind: input, shape index: {}]   ;;  %s411_s4 = inlined_call_operand.hbm [shape: f32[1,128], index: 4, kind: input, shape index: {}]   ;;  %s412_s5 = inlined_call_operand.vmem [shape: u32[8,128], index: 5, kind: input, shape index: {}]   ;;  %s413_s6 = inlined_call_operand.hbm [shape: f32[8,128], index: 6, kind: output, shape index: {}]  }
   0x1   :  { %12 = vsyncpa [#allocation6], 0 }
   0x2   :  { %13 = vsyncpa [#allocation9], 0 }
   0x3   :  { %14 = vsyncpa [#allocation4], 0  ;;  %s342_s21 = smov [#allocation5]  }
   0x4   :  { %s30_s22 = sshll.u32 %s342_s21, 4  ;;  %s31_s22 = int_to_ptr.vmem [resolvable:$true] %s30_s22 }
   0x5   :  { %s242_s23 = scalar_lea.vmem %s31_s22, 256  ;;  %p247_p1 = scmp.lt.s32.totalorder %s31_s22, %s31_s22 }
   0x6   :  { %p243_p0 = scmp.ne.s32.totalorder %s31_s22, %s242_s23  ;;  %p248_p2 = scmp.lt.s32.totalorder %s242_s23, %s242_s23 }
   0x8   :  { %p249_p3 = por %p248_p2, %p247_p1 }
   0xa   :  { %p250_p4 = pnand %p249_p3, %p243_p0 }
   0xc   :  { %253 = shalt.err (!%p250_p4)
}
   0xd   :  { %s343_s24 = smov 64   ;;  %s344_s25 = smov 4  }
   0xe   :  { %36 = dma.hbm_to_vmem [thread:$0]  %s408_s1, 256, %s31_s22, [#allocation6], %s343_s24, %s343_s24, %s344_s25  }
   0xf   :  { %s345_s28 = smov [#allocation2]   ;;  %s346_s30 = smov [#allocation7]  }
  0x10   :  { %s21_s29 = sshll.u32 %s345_s28, 4  ;;  %s45_s7 = sshll.u32 %s346_s30, 4  ;;  %s22_s29 = int_to_ptr.vmem [resolvable:$true] %s21_s29  ;;  %s46_s7 = int_to_ptr.vmem [resolvable:$true] %s45_s7 }
  0x11   :  { %s262_s8 = scalar_lea.vmem %s22_s29, 64  ;;  %p267_p6 = scmp.lt.s32.totalorder %s22_s29, %s22_s29 }
  0x12   :  { %p263_p5 = scmp.ne.s32.totalorder %s22_s29, %s262_s8  ;;  %p268_p7 = scmp.lt.s32.totalorder %s262_s8, %s262_s8 }
  0x14   :  { %p269_p8 = por %p268_p7, %p267_p6 }
  0x16   :  { %p270_p9 = pnand %p269_p8, %p263_p5 }
  0x18   :  { %273 = shalt.err (!%p270_p9)
}
  0x19   :  { %24 = dma.hbm_to_vmem [thread:$0]  %s407_s0, 64, %s22_s29, [#allocation3]  }
  0x1a   :  { %s282_s11 = scalar_lea.vmem %s46_s7, 16  ;;  %s286_s1 = scalar_lea.vmem %s46_s7, 32 }
  0x1b   :  { %p283_p10 = scmp.ne.s32.totalorder %s46_s7, %s282_s11  ;;  %p287_p11 = scmp.lt.s32.totalorder %s46_s7, %s46_s7 }
  0x1c   :  { %p288_p12 = scmp.lt.s32.totalorder %s286_s1, %s282_s11 }
  0x1e   :  { %p289_p13 = por %p288_p12, %p287_p11 }
  0x20   :  { %p290_p0 = pnand %p289_p13, %p283_p10 }
  0x22   :  { %293 = shalt.err (!%p290_p0)
}
  0x23   :  { %48 = dma.hbm_to_vmem [thread:$0]  %s410_s3, 16, %s46_s7, [#allocation6]  }
  0x24   :  { %s347_s14 = smov [#allocation8]  }
  0x25   :  { %s55_s15 = sshll.u32 %s347_s14, 4  ;;  %s56_s15 = int_to_ptr.vmem [resolvable:$true] %s55_s15 }
  0x26   :  { %s302_s16 = scalar_lea.vmem %s56_s15, 16  ;;  %s306_s17 = scalar_lea.vmem %s56_s15, 32 }
  0x27   :  { %p303_p1 = scmp.ne.s32.totalorder %s56_s15, %s302_s16  ;;  %p307_p2 = scmp.lt.s32.totalorder %s56_s15, %s56_s15 }
  0x28   :  { %p308_p3 = scmp.lt.s32.totalorder %s306_s17, %s302_s16 }
  0x2a   :  { %p309_p4 = por %p308_p3, %p307_p2 }
  0x2c   :  { %p310_p5 = pnand %p309_p4, %p303_p1 }
  0x2e   :  { %313 = shalt.err (!%p310_p5)
}
  0x2f   :  { %58 = dma.hbm_to_vmem [thread:$0]  %s411_s4, 16, %s56_s15, [#allocation9]  }
  0x30   :  { %334 = dma.done.wait [#allocation3], 64  }
  0x31   :  { %335 = vsyncadd [#allocation3], 4294967232 }
  0x32   :  { %336 = dma.done.wait [#allocation6], 272  }
  0x33   :  { %337 = vsyncadd [#allocation6], 4294967024 }
  0x34   :  { %338 = dma.done.wait [#allocation9], 16  }
  0x35   :  { %339 = vsyncadd [#allocation9], 4294967280  ;;  %v348_v0 = vmov 0.0   ;;  %vm349_vm0 = vmmov 0   ;;  %v230_v1 = vld [vmem:[#allocation5 + $0x8] sm:$0xff]   ;;  %v231_v2 = vld [vmem:[#allocation5] sm:$0xff]   ;;  %v174_v29 = vlaneseq }
  0x36   :  { %213 = vmatprep.subr.bf16.mxu0 %v348_v0  ;;  %217 = vmatprep.mubr.msk.bf16.mxu0 %vm349_vm0, %v348_v0  ;;  %v74_v3 = vld [vmem:[#allocation2] sm:$0xf]  ;;  %vm98_vm1 = vcmask 261120   ;;  %v162_v31 = vld [vmem:[#allocation7] sm:$0x1]  ;;  %s350_s20 = smov [#allocation10]  }
  0x37   :  { %214 = vmatpush3.bf16.msra.mxu0 %v230_v1  ;;  %v206_v4 = vld [vmem:[%s409_s2] ss:$0 sm:$0xff]  ;;  %v175_v30 = vshrl.u32 %v174_v29, 7  ;;  %v167_v35 = vld [vmem:[#allocation8] sm:$0x1]  ;;  %s195_s21 = sshll.u32 %s350_s20, 4  ;;  %s196_s21 = int_to_ptr.vmem [resolvable:$true] %s195_s21 }
  0x38   :  { %215 = vmatprep.subr.bf16.mxu0 %v348_v0  ;;  %v171_v41 = vld [vmem:[%s412_s5] sm:$0xff]  ;;  %s314_s22 = scalar_lea.vmem %s196_s21, 128  ;;  %p319_p7 = scmp.lt.s32.totalorder %s196_s21, %s196_s21 }
  0x39   :  { %v176_v34 = vsub.s32 0, %v175_v30  ;;  %vm172_vm3 = vcmp.ge.u32.totalorder %v171_v41, 858993459  ;;  %p315_p6 = scmp.ne.s32.totalorder %s196_s21, %s314_s22  ;;  %p320_p8 = scmp.lt.s32.totalorder %s314_s22, %s314_s22 }
  0x3b   :  { %216 = vmatpush3.bf16.msra.mxu0 %v231_v2  ;;  %p321_p9 = por %p320_p8, %p319_p7 }
  0x3d   :  { %p322_p10 = pnand %p321_p9, %p315_p6 }
  0x3e   :  { %218 = vmatmul.mubr.msk.bf16.vlgmr.msra.gmra.mxu0 %vm98_vm1, %v74_v3 }
  0xfe   :  { %v136_v5 = vpop.f32.mrf.mxu0 }
  0xff   :  { %v137_v6 = vadd.f32 %v206_v4, %v136_v5 }
 0x100   :  { %v219_v7 = vpop.f32.mrf.mxu0 }
 0x101   :  { %vm142_vm2 = vcmp.ge.f32.partialorder %v137_v6, 0.0  ;;  %v143_v8 = vmul.f32 0.01, %v137_v6 }
 0x102   :  { %v139_v9 = vpop.f32.mrf.mxu0 }
 0x103   :  { %v144_v10 = vsel %vm142_vm2, %v137_v6, %v143_v8 }
 0x104   :  { %v145_v11 = vrot.slane %v144_v10, 4  ;;  %v220_v12 = vpop.f32.mrf.mxu0 }
 0x106   :  { %v146_v13 = vadd.f32 %v145_v11, %v144_v10 }
 0x108   :  { %v147_v14 = vrot.slane %v146_v13, 2 }
 0x10a   :  { %v148_v15 = vadd.f32 %v147_v14, %v146_v13 }
 0x10c   :  { %v149_v16 = vrot.slane %v148_v15, 1 }
 0x10e   :  { %v150_v17 = vadd.f32 %v149_v16, %v148_v15 }
 0x110   :  { %v152_v18 = vmul.f32 0.125, %v150_v17 }
 0x112   :  { %v153_v19 = vsub.f32 %v144_v10, %v152_v18 }
 0x114   :  { %v154_v20 = vmul.f32 %v153_v19, %v153_v19 }
 0x116   :  { %v155_v21 = vrot.slane %v154_v20, 4 }
 0x118   :  { %v156_v22 = vadd.f32 %v155_v21, %v154_v20 }
 0x11a   :  { %v157_v23 = vrot.slane %v156_v22, 2 }
 0x11c   :  { %v158_v24 = vadd.f32 %v157_v23, %v156_v22 }
 0x11e   :  { %v159_v25 = vrot.slane %v158_v24, 1 }
 0x120   :  { %v160_v26 = vadd.f32 %v159_v25, %v158_v24 }
 0x122   :  { %v161_v27 = vmul.f32 0.125, %v160_v26 }
 0x124   :  { %v163_v28 = vadd.f32 1e-05, %v161_v27 }
 0x126   :  { %232 = vrsqrt.f32 %v163_v28 }
 0x133   :  { %v233_v32 = vpop.eup %232 }
 0x134   :  { %v165_v33 = vmul.f32 %v233_v32, %v162_v31 }
 0x136   :  { %v166_v36 = vmul.f32 1.25, %v165_v33  ;;  %v168_v37 = vmul.f32 %v165_v33, %v152_v18 }
 0x138   :  { %v169_v38 = vsub.f32 %v167_v35, %v168_v37  ;;  %v177_v39 = vrot.slane %v166_v36, %v176_v34 }
 0x13a   :  { %v170_v40 = vmul.f32 1.25, %v169_v38  ;;  %v179_v42 = vmul.f32 %v177_v39, %v144_v10 }
 0x13c   :  { %v184_v43 = vrot.slane %v170_v40, %v176_v34 }
 0x13e   :  { %v186_v44 = vadd.f32 %v184_v43, %v179_v42 }
 0x140   :  { %v187_v45 = vsel %vm172_vm3, %v186_v44, 0.0 }
 0x141   :  { %188 = vst [vmem:[#allocation10] sm:$0xff] %v187_v45 }
 0x142   :  { %325 = shalt.err (!%p322_p10)
}
 0x143   :  { %198 = dma.vmem_to_hbm [thread:$0]  %s196_s21, 128, %s413_s6, [#allocation4]  }
 0x144   :  { %340 = dma.done.wait [#allocation4], 128  }
 0x145   :  { %341 = vsyncadd [#allocation4], 4294967168 }
 0x146   :  { %202 = vsyncpa [#allocation3], 1 }
 0x147   :  { %203 = vsyncpa [#allocation6], 1 }
 0x148   :  { %204 = vsyncpa [#allocation9], 1 }
 0x149   :  { %205 = vsyncpa [#allocation4], 1 }

</bundles_post_ra>
